<compile_context>
chip_gen: v6e
topology: v6e:2x2x1
jax: 0.10.0
libtpu: 0.0.40
codegen_flags: <defaults>
</compile_context>

<pallas_src>
import functools

import jax
import jax.numpy as jnp
from jax import lax
from jax.experimental import pallas as pl
from jax.experimental.pallas import tpu as pltpu


# Above this im2col-patch size we switch to per-tap accumulation (no 9x patch).
_IM2COL_PATCH_BYTES_MAX = 2 * 1024 * 1024


def _vmem_limit_bytes():
    """Generation-aware scoped-VMEM budget (~half of physical VMEM)."""
    try:
        cap = int(pltpu.get_tpu_info().vmem_capacity_bytes)
    except Exception:
        cap = 64 * 1024 * 1024          # unknown -> conservative (v7x-safe) 32 MiB
    return min(96 * 1024 * 1024, max(32 * 1024 * 1024, cap // 2))


def _fusion_kernel(xa_ref, w_ref, b_ref, wp_ref, bp_ref, out_ref,
                   *, H, W, C, CB, tap_accum):
    """One batch element per grid step (channels on the 128-lane axis).

    xa_ref: (1, H+2, W+2, C+1)  zero-padded concat([x, att], channel)
    w_ref : (9*CB, 2C)  block-stacked im2col weights of conv_l / conv_r with
                        the eval-mode BN scale folded into the columns
                        (CB = 2C+1 "big" input channels: [x, att, x*att];
                         cols 0..C-1 = left branch, C..2C-1 = right branch)
    b_ref : (1, 2C)     conv bias + BN shift, folded (f32)
    wp_ref: (C, COp)    1x1 projection weight, lane padded
    bp_ref: (1, COp)    projection bias, lane padded (f32)
    out_ref:(1, H*W, COp)  f32
    """
    xa = xa_ref[0]                                   # (H+2, W+2, C+1)
    xp = xa[:, :, :C]                                # x
    ap = xa[:, :, C:]                                # att (1 channel)
    # "big" conv input: channels [x, att, x*att]; zero pads stay zero.
    big = jnp.concatenate([xa, xp * ap], axis=-1)    # (H+2, W+2, CB)

    if tap_accum:
        # Accumulate over the 9 conv taps: same total K = 9*CB on the MXU but
        # no (H*W, 9*CB) im2col patch and no lane-unaligned concats.
        acc = jnp.zeros((H * W, 2 * C), jnp.float32)
        for dh in range(3):
            for dw in range(3):
                t = dh * 3 + dw
                slab = big[dh:dh + H, dw:dw + W, :].reshape(H * W, CB)
                acc = acc + jnp.dot(slab, w_ref[t * CB:(t + 1) * CB, :],
                                    preferred_element_type=jnp.float32)
    else:
        # Tiny problem: single im2col patch + one MXU pass (K = 9*CB).
        # Column ordering: dh*3*CB + dw*CB + c (matches the weight stacking).
        wparts = [big[:, dw:dw + W, :] for dw in range(3)]
        zw = jnp.concatenate(wparts, axis=-1)        # (H+2, W, 3*CB)
        hparts = [zw[dh:dh + H].reshape(H * W, 3 * CB) for dh in range(3)]
        patch = jnp.concatenate(hparts, axis=-1)     # (H*W, 9*CB)
        acc = jnp.dot(patch, w_ref[...], preferred_element_type=jnp.float32)

    # BN scale already folded into w; only the folded bias remains.
    z = acc + b_ref[...]
    sw = z * jax.nn.sigmoid(z)                       # Swish (EUP sigmoid)
    x12 = (sw[:, :C] * sw[:, C:]).astype(wp_ref.dtype)   # x1 * x2

    # Lane-dense (COp = multiple of 128) projection + bias.
    out_ref[0] = (jnp.dot(x12, wp_ref[...], preferred_element_type=jnp.float32)
                  + bp_ref[...])


def prepare_params(params, compute_dtype=jnp.bfloat16, eps=1e-5):
    """Host-side parameter preprocessing, hoisted so it runs ONCE per model:
    OIHW->HWIO transpose, eval-mode BN folding (scale into weight columns,
    shift into bias), block stacking of both 3x3 convs, lane padding of the
    1x1 projection."""
    CO, C = params["wp"].shape[:2]
    C1 = params["wl"].shape[1]
    nhead = C1 - C
    assert nhead == 1, "x * att broadcasting requires nhead == 1"
    CB = 2 * C + 1
    # NOTE: for CO << 128 on v5e the COp padding is 8x output-write
    # amplification; benchmark masked CO-wide stores there if it matters.
    COp = ((CO + 127) // 128) * 128

    # eval-mode BN: scale s = gamma/sqrt(var+eps), shift = (b - mean)*s + beta
    sl = params["gamma_l"] / jnp.sqrt(params["var_l"] + eps)
    bl = (params["bl"] - params["mean_l"]) * sl + params["beta_l"]
    sr = params["gamma_r"] / jnp.sqrt(params["var_r"] + eps)
    br = (params["br"] - params["mean_r"]) * sr + params["beta_r"]

    wl = jnp.transpose(params["wl"], (2, 3, 1, 0)) * sl   # HWIO (3,3,C1,C), scale folded
    wr = jnp.transpose(params["wr"], (2, 3, 1, 0)) * sr   # (3,3,C,C), scale folded
    w_big = jnp.zeros((3, 3, CB, 2 * C), jnp.float32)
    w_big = w_big.at[:, :, :C1, :C].set(wl)               # [x, att] -> left branch
    w_big = w_big.at[:, :, C1:, C:].set(wr)               # x*att    -> right branch
    w_big = w_big.reshape(9 * CB, 2 * C).astype(compute_dtype)

    b_big = jnp.concatenate([bl, br])[None, :].astype(jnp.float32)   # (1, 2C)

    wp = params["wp"][:, :, 0, 0].T                        # (C, CO)
    wp_p = jnp.zeros((C, COp), compute_dtype).at[:, :CO].set(wp.astype(compute_dtype))
    bp_p = jnp.zeros((1, COp), jnp.float32).at[0, :CO].set(params["bp"])

    return {"w_big": w_big, "b_big": b_big, "wp_p": wp_p, "bp_p": bp_p,
            "C": C, "CO": CO, "COp": COp, "CB": CB, "compute_dtype": compute_dtype}


def attention_fusion_pallas(prep, x_nchw, att_nchw, tap_accum=None):
    B, C, H, W = x_nchw.shape
    nhead = att_nchw.shape[1]
    assert nhead == 1, "x * att broadcasting requires nhead == 1"
    assert C == prep["C"]
    CB, CO, COp = prep["CB"], prep["CO"], prep["COp"]
    cdt = prep["compute_dtype"]

    # Layout glue: NCHW -> NHWC, att appended as the last channel (single
    # lane-dense input array), 1-pixel zero pad for the SAME 3x3 convs.
    xa = jnp.concatenate([jnp.transpose(x_nchw, (0, 2, 3, 1)),
                          jnp.transpose(att_nchw, (0, 2, 3, 1))], axis=-1)
    xa_p = jnp.pad(xa, ((0, 0), (1, 1), (1, 1), (0, 0))).astype(cdt)

    if tap_accum is None:
        patch_bytes = H * W * 9 * CB * jnp.dtype(cdt).itemsize
        tap_accum = patch_bytes > _IM2COL_PATCH_BYTES_MAX

    kernel = functools.partial(_fusion_kernel, H=H, W=W, C=C, CB=CB,
                               tap_accum=bool(tap_accum))
    out_flat = pl.pallas_call(
        kernel,
        out_shape=jax.ShapeDtypeStruct((B, H * W, COp), jnp.float32),
        grid=(B,),
        in_specs=[
            pl.BlockSpec((1, H + 2, W + 2, C + 1), lambda b: (b, 0, 0, 0)),
            pl.BlockSpec((9 * CB, 2 * C), lambda b: (0, 0)),
            pl.BlockSpec((1, 2 * C), lambda b: (0, 0)),
            pl.BlockSpec((C, COp), lambda b: (0, 0)),
            pl.BlockSpec((1, COp), lambda b: (0, 0)),
        ],
        out_specs=pl.BlockSpec((1, H * W, COp), lambda b: (b, 0, 0)),
        compiler_params=pltpu.CompilerParams(
            dimension_semantics=("parallel",),      # batch steps spread over v7x's 2 TCs
            vmem_limit_bytes=_vmem_limit_bytes(),
        ),
    )(xa_p, prep["w_big"], prep["b_big"], prep["wp_p"], prep["bp_p"])

    out = out_flat[:, :, :CO].reshape(B, H, W, CO)
    return jnp.transpose(out, (0, 3, 1, 2))         # back to NCHW


# ---------------- deterministic parameter init (synthetic) -----------------
def init_params(key, vit_ch, out_ch, nhead):
    ks = jax.random.split(key, 16)
    c1 = vit_ch + nhead
    p = {}
    p["wl"] = 0.1 * jax.random.normal(ks[0], (vit_ch, c1, 3, 3), jnp.float32)
    p["bl"] = 0.1 * jax.random.normal(ks[1], (vit_ch,), jnp.float32)
    p["wr"] = 0.1 * jax.random.normal(ks[2], (vit_ch, vit_ch, 3, 3), jnp.float32)
    p["br"] = 0.1 * jax.random.normal(ks[3], (vit_ch,), jnp.float32)
    p["gamma_l"] = 1.0 + 0.1 * jax.random.normal(ks[4], (vit_ch,), jnp.float32)
    p["beta_l"] = 0.1 * jax.random.normal(ks[5], (vit_ch,), jnp.float32)
    p["mean_l"] = 0.1 * jax.random.normal(ks[6], (vit_ch,), jnp.float32)
    p["var_l"] = jax.random.uniform(ks[7], (vit_ch,), jnp.float32, 0.5, 1.5)
    p["gamma_r"] = 1.0 + 0.1 * jax.random.normal(ks[8], (vit_ch,), jnp.float32)
    p["beta_r"] = 0.1 * jax.random.normal(ks[9], (vit_ch,), jnp.float32)
    p["mean_r"] = 0.1 * jax.random.normal(ks[10], (vit_ch,), jnp.float32)
    p["var_r"] = jax.random.uniform(ks[11], (vit_ch,), jnp.float32, 0.5, 1.5)
    p["wp"] = 0.1 * jax.random.normal(ks[12], (out_ch, vit_ch, 1, 1), jnp.float32)
    p["bp"] = 0.1 * jax.random.normal(ks[13], (out_ch,), jnp.float32)
    return p


# ---------------- pure-JAX reference (NCHW, eval-mode BN) -------------------
def ref_forward(params, x, att):
    eps = 1e-5

    def conv(z, w):
        return lax.conv_general_dilated(
            z, w, (1, 1), "SAME", dimension_numbers=("NCHW", "OIHW", "NCHW"))

    def bn(z, g, b, m, v):
        c = lambda a: a[None, :, None, None]
        return (z - c(m)) / jnp.sqrt(c(v) + eps) * c(g) + c(b)

    def swish(z):
        return z * jax.nn.sigmoid(z)

    xcat = jnp.concatenate([x, att], axis=1)
    y_l = conv(xcat, params["wl"]) + params["bl"][None, :, None, None]
    x1 = swish(bn(y_l, params["gamma_l"], params["beta_l"],
                  params["mean_l"], params["var_l"]))
    y_r = conv(x * att, params["wr"]) + params["br"][None, :, None, None]
    x2 = swish(bn(y_r, params["gamma_r"], params["beta_r"],
                  params["mean_r"], params["var_r"]))
    return conv(x1 * x2, params["wp"]) + params["bp"][None, :, None, None]


if __name__ == "__main__":
    key = jax.random.PRNGKey(0)

    def run_case(idx, B, vit_ch, out_ch, H, W, compute_dtype, tap_accum,
                 max_abs_tol, rel_tol):
        kp, kx, ka = jax.random.split(jax.random.fold_in(key, idx), 3)
        params = init_params(kp, vit_ch, out_ch, 1)
        x = jax.random.normal(kx, (B, vit_ch, H, W), jnp.float32)
        att = jax.nn.sigmoid(jax.random.normal(ka, (B, 1, H, W), jnp.float32))

        prep = prepare_params(params, compute_dtype=compute_dtype)
        out = attention_fusion_pallas(prep, x, att, tap_accum=tap_accum)
        out = jax.block_until_ready(out)

        ref = ref_forward(params, x, att)
        assert out.shape == ref.shape == (B, out_ch, H, W)
        max_abs = float(jnp.max(jnp.abs(out - ref)))
        rel = float(jnp.linalg.norm(out - ref) / (jnp.linalg.norm(ref) + 1e-12))
        assert max_abs < max_abs_tol and rel < rel_tol, (
            f"case {idx}: max_abs={max_abs:.3e} (tol {max_abs_tol}), "
            f"rel={rel:.3e} (tol {rel_tol})")

    # 1) tiny config, f32 operands, single-matmul im2col path
    run_case(0, B=2, vit_ch=8, out_ch=16, H=8, W=8,
             compute_dtype=jnp.float32, tap_accum=False,
             max_abs_tol=5e-3, rel_tol=5e-3)
    # 2) medium config, f32 operands, per-tap accumulation path
    run_case(1, B=2, vit_ch=32, out_ch=32, H=16, W=16,
             compute_dtype=jnp.float32, tap_accum=True,
             max_abs_tol=5e-3, rel_tol=5e-3)
    # 3) medium config, bf16 operands / f32 accumulation (MXU-native path)
    run_case(2, B=2, vit_ch=32, out_ch=32, H=16, W=16,
             compute_dtype=jnp.bfloat16, tap_accum=True,
             max_abs_tol=0.25, rel_tol=4e-2)

    print("KERNEL_OK")
</pallas_src>

<mosaic_0001>
module attributes {stable_mosaic.version = 11 : i64} {
  func.func @_fusion_kernel(%arg0: i32, %arg1: memref<1x10x10x9xf32, #tpu.memory_space<vmem>>, %arg2: memref<153x16xf32, #tpu.memory_space<vmem>>, %arg3: memref<1x16xf32, #tpu.memory_space<vmem>>, %arg4: memref<8x128xf32, #tpu.memory_space<vmem>>, %arg5: memref<1x128xf32, #tpu.memory_space<vmem>>, %arg6: memref<1x64x128xf32, #tpu.memory_space<vmem>>) attributes {dimension_semantics = [#tpu.dimension_semantics<parallel>], iteration_bounds = array<i64: 2>, scalar_prefetch = 0 : i64, scratch_operands = 0 : i64, tpu.core_type = #tpu.core_type<tc>, window_params = [{transform_indices = @transform_0, window_bounds = array<i64: 1, 10, 10, 9>}, {pipeline_mode = #tpu.pipeline_mode<synchronous>, transform_indices = @transform_1, window_bounds = array<i64: 153, 16>}, {pipeline_mode = #tpu.pipeline_mode<synchronous>, transform_indices = @transform_2, window_bounds = array<i64: 1, 16>}, {pipeline_mode = #tpu.pipeline_mode<synchronous>, transform_indices = @transform_3, window_bounds = array<i64: 8, 128>}, {pipeline_mode = #tpu.pipeline_mode<synchronous>, transform_indices = @transform_4, window_bounds = array<i64: 1, 128>}, {transform_indices = @transform_5, window_bounds = array<i64: 1, 64, 128>}]} {
    %c0 = arith.constant 0 : index
    %c0_0 = arith.constant 0 : index
    %c0_1 = arith.constant 0 : index
    %c0_2 = arith.constant 0 : index
    %0 = vector.load %arg1[%c0, %c0_0, %c0_1, %c0_2] : memref<1x10x10x9xf32, #tpu.memory_space<vmem>>, vector<1x10x10x9xf32>
    %1 = vector.shape_cast %0 : vector<1x10x10x9xf32> to vector<10x10x9xf32>
    %2 = vector.extract_strided_slice %1 {offsets = [0, 0, 0], sizes = [10, 10, 8], strides = [1, 1, 1]} : vector<10x10x9xf32> to vector<10x10x8xf32>
    %3 = vector.extract_strided_slice %1 {offsets = [0, 0, 8], sizes = [10, 10, 1], strides = [1, 1, 1]} : vector<10x10x9xf32> to vector<10x10x1xf32>
    %4 = vector.broadcast %3 : vector<10x10x1xf32> to vector<10x10x8xf32>
    %5 = arith.mulf %2, %4 : vector<10x10x8xf32>
    %6 = tpu.concatenate %1, %5 in 2 : vector<10x10x9xf32>, vector<10x10x8xf32> -> vector<10x10x17xf32>
    %7 = vector.extract_strided_slice %6 {offsets = [0, 0, 0], sizes = [10, 8, 17], strides = [1, 1, 1]} : vector<10x10x17xf32> to vector<10x8x17xf32>
    %8 = vector.extract_strided_slice %6 {offsets = [0, 1, 0], sizes = [10, 8, 17], strides = [1, 1, 1]} : vector<10x10x17xf32> to vector<10x8x17xf32>
    %9 = vector.extract_strided_slice %6 {offsets = [0, 2, 0], sizes = [10, 8, 17], strides = [1, 1, 1]} : vector<10x10x17xf32> to vector<10x8x17xf32>
    %10 = tpu.concatenate %7, %8, %9 in 2 : vector<10x8x17xf32>, vector<10x8x17xf32>, vector<10x8x17xf32> -> vector<10x8x51xf32>
    %11 = vector.extract_strided_slice %10 {offsets = [0, 0, 0], sizes = [8, 8, 51], strides = [1, 1, 1]} : vector<10x8x51xf32> to vector<8x8x51xf32>
    %12 = vector.shape_cast %11 : vector<8x8x51xf32> to vector<64x51xf32>
    %13 = vector.extract_strided_slice %10 {offsets = [1, 0, 0], sizes = [8, 8, 51], strides = [1, 1, 1]} : vector<10x8x51xf32> to vector<8x8x51xf32>
    %14 = vector.shape_cast %13 : vector<8x8x51xf32> to vector<64x51xf32>
    %15 = vector.extract_strided_slice %10 {offsets = [2, 0, 0], sizes = [8, 8, 51], strides = [1, 1, 1]} : vector<10x8x51xf32> to vector<8x8x51xf32>
    %16 = vector.shape_cast %15 : vector<8x8x51xf32> to vector<64x51xf32>
    %17 = tpu.concatenate %12, %14, %16 in 1 : vector<64x51xf32>, vector<64x51xf32>, vector<64x51xf32> -> vector<64x153xf32>
    %c0_3 = arith.constant 0 : index
    %c0_4 = arith.constant 0 : index
    %18 = vector.load %arg2[%c0_3, %c0_4] : memref<153x16xf32, #tpu.memory_space<vmem>>, vector<153x16xf32>
    %cst = arith.constant dense<0.000000e+00> : vector<64x16xf32>
    %19 = tpu.matmul %17, %18, %cst {dimension_numbers = #tpu.dot_dimension_numbers<[1], [0], [0], [1], [0, 0, 1, 1], [], []>} : vector<64x153xf32>, vector<153x16xf32>, vector<64x16xf32> -> vector<64x16xf32>
    %c0_5 = arith.constant 0 : index
    %c0_6 = arith.constant 0 : index
    %20 = vector.load %arg3[%c0_5, %c0_6] : memref<1x16xf32, #tpu.memory_space<vmem>>, vector<1x16xf32>
    %21 = vector.broadcast %20 : vector<1x16xf32> to vector<64x16xf32>
    %22 = arith.addf %19, %21 : vector<64x16xf32>
    %23 = arith.negf %22 : vector<64x16xf32>
    %24 = math.exp %23 : vector<64x16xf32>
    %cst_7 = arith.constant 1.000000e+00 : f32
    %25 = vector.broadcast %cst_7 : f32 to vector<64x16xf32>
    %26 = arith.addf %25, %24 : vector<64x16xf32>
    %27 = arith.divf %25, %26 : vector<64x16xf32>
    %28 = arith.mulf %22, %27 : vector<64x16xf32>
    %29 = vector.extract_strided_slice %28 {offsets = [0, 0], sizes = [64, 8], strides = [1, 1]} : vector<64x16xf32> to vector<64x8xf32>
    %30 = vector.extract_strided_slice %28 {offsets = [0, 8], sizes = [64, 8], strides = [1, 1]} : vector<64x16xf32> to vector<64x8xf32>
    %31 = arith.mulf %29, %30 : vector<64x8xf32>
    %c0_8 = arith.constant 0 : index
    %c0_9 = arith.constant 0 : index
    %32 = vector.load %arg4[%c0_8, %c0_9] : memref<8x128xf32, #tpu.memory_space<vmem>>, vector<8x128xf32>
    %cst_10 = arith.constant dense<0.000000e+00> : vector<64x128xf32>
    %33 = tpu.matmul %31, %32, %cst_10 {dimension_numbers = #tpu.dot_dimension_numbers<[1], [0], [0], [1], [0, 0, 1, 1], [], []>} : vector<64x8xf32>, vector<8x128xf32>, vector<64x128xf32> -> vector<64x128xf32>
    %c0_11 = arith.constant 0 : index
    %c0_12 = arith.constant 0 : index
    %34 = vector.load %arg5[%c0_11, %c0_12] : memref<1x128xf32, #tpu.memory_space<vmem>>, vector<1x128xf32>
    %35 = vector.broadcast %34 : vector<1x128xf32> to vector<64x128xf32>
    %36 = arith.addf %33, %35 : vector<64x128xf32>
    %c0_13 = arith.constant 0 : index
    %c0_14 = arith.constant 0 : index
    %c0_15 = arith.constant 0 : index
    %37 = vector.load %arg6[%c0_13, %c0_14, %c0_15] : memref<1x64x128xf32, #tpu.memory_space<vmem>>, vector<1x64x128xf32>
    %38 = vector.shape_cast %37 : vector<1x64x128xf32> to vector<64x128xf32>
    %39 = vector.shape_cast %36 : vector<64x128xf32> to vector<1x64x128xf32>
    tpu.vector_store %arg6[%c0_13, %c0_14, %c0_15], %39 {strides = array<i32>} : memref<1x64x128xf32, #tpu.memory_space<vmem>>, vector<1x64x128xf32>,
    return
  }
  func.func @transform_0(%arg0: i32) -> (i32, i32, i32, i32) {
    %c0_i32 = arith.constant 0 : i32
    %c0_i32_0 = arith.constant 0 : i32
    %c0_i32_1 = arith.constant 0 : i32
    %c0_i32_2 = arith.constant 0 : i32
    return %arg0, %c0_i32, %c0_i32_0, %c0_i32_1 : i32, i32, i32, i32
  }
  func.func @transform_1(%arg0: i32) -> (i32, i32) {
    %c0_i32 = arith.constant 0 : i32
    %c0_i32_0 = arith.constant 0 : i32
    %c0_i32_1 = arith.constant 0 : i32
    return %c0_i32, %c0_i32_0 : i32, i32
  }
  func.func @transform_2(%arg0: i32) -> (i32, i32) {
    %c0_i32 = arith.constant 0 : i32
    %c0_i32_0 = arith.constant 0 : i32
    %c0_i32_1 = arith.constant 0 : i32
    return %c0_i32, %c0_i32_0 : i32, i32
  }
  func.func @transform_3(%arg0: i32) -> (i32, i32) {
    %c0_i32 = arith.constant 0 : i32
    %c0_i32_0 = arith.constant 0 : i32
    %c0_i32_1 = arith.constant 0 : i32
    return %c0_i32, %c0_i32_0 : i32, i32
  }
  func.func @transform_4(%arg0: i32) -> (i32, i32) {
    %c0_i32 = arith.constant 0 : i32
    %c0_i32_0 = arith.constant 0 : i32
    %c0_i32_1 = arith.constant 0 : i32
    return %c0_i32, %c0_i32_0 : i32, i32
  }
  func.func @transform_5(%arg0: i32) -> (i32, i32, i32) {
    %c0_i32 = arith.constant 0 : i32
    %c0_i32_0 = arith.constant 0 : i32
    %c0_i32_1 = arith.constant 0 : i32
    return %arg0, %c0_i32, %c0_i32_0 : i32, i32, i32
  }
}

</mosaic_0001>

<bundles_post_ra>
// kernel: tpu_custom_call.1
= control target key start
LH: loop header
LB: loop body
LE: loop exit
PB: predicated region body
PF: predicated region fallthrough
CT: control target
= control target key end

     0   :  { %10 = vsyncpa [#allocation3], 0  ;;  %s2060_s0 = inlined_call_operand.vmem [shape: f32[2,10,10,9], index: 0, kind: input, shape index: {}]   ;;  %s2061_s1 = inlined_call_operand.vmem [shape: f32[153,16], index: 1, kind: input, shape index: {}]   ;;  %s2062_s2 = inlined_call_operand.vmem [shape: f32[1,16], index: 2, kind: input, shape index: {}]   ;;  %s2063_s3 = inlined_call_operand.vmem [shape: f32[8,128], index: 3, kind: input, shape index: {}]   ;;  %s2064_s4 = inlined_call_operand.vmem [shape: f32[1,128], index: 4, kind: input, shape index: {}]   ;;  %s2065_s5 = inlined_call_operand.hbm [shape: f32[2,64,128], index: 5, kind: output, shape index: {}]  }
   0x1   :  { %12 = vsyncpa [#allocation3 + $0x1], 0  ;;  %s1488_s18 = smov 0   ;;  %s1490_s19 = smov 0  }
   0x2   :  { %s1492_s20 = smov 0   ;;  %s1494_s21 = smov 0  }
   0x3 LB: > { %s1509_s22 = sadd.s32 4294967295, %s1445_s21   ;;  %s1174_s23 = sadd.s32 4294967294, %s1445_s21   ;;  %s1445_s21 = sphi %s1494_s21, %s2071_s21   ;;  %s1441_s20 = sphi %s1492_s20, %s2070_s20   ;;  %s1437_s19 = sphi %s1490_s19, %s2069_s19   ;;  %s1433_s18 = sphi %s1488_s18, %s2068_s18  }
   0x4   : > { %s1513_s24 = sadd.s32 1, %s1445_s21   ;;  %s135_s25 = sadd.s32 1, %s1441_s20 }
   0x5   : > { %s132_s26 = ssub.s32 %s1445_s21, %s1513_s24  ;;  %p145_p0 = scmp.ne.s32.totalorder %s1441_s20, %s1437_s19 }
   0x6   : > { %p133_p1 = scmp.eq.s32.totalorder %s132_s26, 0  ;;  %p146_p2 = scmp.eq.s32.totalorder %s1509_s22, 1 }
   0x7   : > { %p151_p3 = scmp.ne.s32.totalorder %s1437_s19, %s1433_s18  ;;  %p152_p4 = scmp.eq.s32.totalorder %s1174_s23, 1 }
   0x8   : > { %s1524_s27 = scalar_select %p133_p1, %s1441_s20, %s135_s25  }
   0x9   : > { %p1526_p5 = por %p146_p2, %p145_p0  ;;  %p1530_p6 = por %p152_p4, %p151_p3 }
   0xa   : > { %p1177_p7 = scmp.ge.s32.totalorder %s1445_s21, 1  ;;  %p190_p8 = scmp.lt.s32.totalorder %s1445_s21, 3 }
   0xc   : > { %p191_p9 = pnand %p1177_p7, %p190_p8 }
   0xd   : > { %p218_p10 = scmp.lt.s32.totalorder (!%p191_p9), %s1509_s22, 1  ;;  %s1448_s10 = smov (!%p191_p9), 9  }
   0xe   : > { %194 = sbr.rel (%p191_p9) target bundleno = 1103 (0x44f), region = 40  ;;  %s1449_s11 = smov (!%p191_p9), 17  }
   0xf   : > { %s1450_s12 = smov (!%p191_p9), 34   ;;  %s1454_s13 = smov (!%p191_p9), 120  }
  0x10   : > { %s215_s14 = sand.u32 (!%p191_p9), 1, %s1437_s19   ;;  %s1212_s17 = sshll.u32 (!%p191_p9), %s1509_s22, 10 }
  0x11   : > { %s1455_s7 = smov (!%p191_p9), [#allocation2]  }
  0x12   : > { %s1389_s8 = sshll.u32 (!%p191_p9), %s1455_s7, 4  ;;  %s1390_s8 = int_to_ptr.vmem [resolvable:$false] %s1389_s8 }
  0x13   : > { %v1447_v0 = vmov 8   ;;  %s219_s30 = scalar_select %p218_p10, %s1509_s22, 1  ;;  %vm443_vm0 = vcmask 72704   ;;  %vm484_vm1 = vcmask 1046528   ;;  %vm545_vm2 = vcmask 1045504  }
  0x14   : > { %1327 = vset.pattern.permute.xlu1 %v1447_v0  ;;  %1326 = vset.pattern.permute.xlu0 %v1447_v0  ;;  %vm747_vm3 = vcmask 1040384   ;;  %vm606_vm4 = vcmask 138240   ;;  %vm617_vm5 = vcmask 277504   ;;  %vm730_vm6 = vcmask 203776   ;;  %s2020_s22 = scalar_lea.sflag [#allocation3], %s215_s14 }
  0x15   : > { %s1276_s6 = smul.u32 160, %s219_s30  ;;  %s1452_s30 = smov 102   ;;  %vm685_vm7 = vcmask 416768   ;;  %vm694_vm8 = vcmask 834560   ;;  %vm960_vm9 = vcmask 64512  }
  0x17   : > { %s1541_s9 = scalar_lea.vmem %s2060_s0, %s1276_s6  ;;  %s1453_s6 = smov 51  }
  0x18   : > { %v1544_v1 = vld [vmem:[%s1541_s9 + $0x20] sm:$0xff]  ;;  %v1547_v2 = vld [vmem:[%s1541_s9 + $0x10] sm:$0xff]  ;;  %v1552_v3 = vld [vmem:[%s1541_s9 + $0x28] sm:$0x3] }
  0x19   : > { %265 = vperm.xlu1 %1327, %v1544_v1   ;;  %255 = vperm.xlu0 %1326, %v1547_v2   ;;  %v1555_v4 = vld [vmem:[%s1541_s9 + $0x18] sm:$0x3]  ;;  %v1563_v6 = vld [vmem:[%s1541_s9 + $0x30] sm:$0xff]  ;;  %v1568_v7 = vld [vmem:[%s1541_s9 + $0x48] sm:$0x3] }
  0x1a   : > { %v1560_v5 = vld [vmem:[%s1541_s9 + $0x38] sm:$0x3]  ;;  %v1571_v8 = vld [vmem:[%s1541_s9 + $0x40] sm:$0xff]  ;;  %v1579_v10 = vld [vmem:[%s1541_s9 + $0x50] sm:$0xff] }
  0x1b   : > { %v1576_v9 = vld [vmem:[%s1541_s9 + $0x58] sm:$0x3]  ;;  %v1584_v11 = vld [vmem:[%s1541_s9 + $0x68] sm:$0x3]  ;;  %v1587_v12 = vld [vmem:[%s1541_s9 + $0x60] sm:$0xff] }
  0x1c   : > { %v1592_v13 = vld [vmem:[%s1541_s9 + $0x78] sm:$0x3]  ;;  %v1595_v14 = vld [vmem:[%s1541_s9 + $0x70] sm:$0xff]  ;;  %v1600_v15 = vld [vmem:[%s1541_s9 + $0x88] sm:$0x3] }
  0x1d   : > { %270 = vperm.xlu1 %1327, %v1552_v3   ;;  %260 = vperm.xlu0 %1326, %v1555_v4   ;;  %v1603_v16 = vld [vmem:[%s1541_s9 + $0x80] sm:$0xff]  ;;  %v1608_v17 = vld [vmem:[%s1541_s9 + $0x98] sm:$0x3]  ;;  %v1611_v18 = vld [vmem:[%s1541_s9 + $0x90] sm:$0xff] }
  0x1e   : > { %v1616_v19 = vld [vmem:[%s1541_s9 + $0x8] sm:$0x3]  ;;  %v1619_v20 = vld [vmem:[%s1541_s9] sm:$0xff]  ;;  %s1391_s9 = scalar_lea.vmem %s1390_s8, 2048 }
  0x21   : > { %280 = vperm.xlu1 %1327, %v1560_v5   ;;  %275 = vperm.xlu0 %1326, %v1563_v6  }
  0x25   : > { %290 = vperm.xlu1 %1327, %v1568_v7   ;;  %285 = vperm.xlu0 %1326, %v1571_v8  }
  0x29   : > { %300 = vperm.xlu1 %1327, %v1576_v9   ;;  %295 = vperm.xlu0 %1326, %v1579_v10  }
  0x2d   : > { %310 = vperm.xlu1 %1327, %v1584_v11   ;;  %305 = vperm.xlu0 %1326, %v1587_v12  }
  0x31   : > { %320 = vperm.xlu1 %1327, %v1592_v13   ;;  %315 = vperm.xlu0 %1326, %v1595_v14  }
  0x35   : > { %330 = vperm.xlu1 %1327, %v1600_v15   ;;  %325 = vperm.xlu0 %1326, %v1603_v16  }
  0x39   : > { %340 = vperm.xlu1 %1327, %v1608_v17   ;;  %335 = vperm.xlu0 %1326, %v1611_v18  }
  0x3d   : > { %250 = vperm.xlu1 %1327, %v1616_v19   ;;  %245 = vperm.xlu0 %1326, %v1619_v20  }
  0x94   : > { %v266_v21 = vpop.permute.xlu1 %265  ;;  %v256_v22 = vpop.permute.xlu0 %255 }
  0x95   : > { %v347_v23 = vmul.f32 %v266_v21, %v1544_v1  ;;  %v345_v26 = vmul.f32 %v256_v22, %v1547_v2 }
  0x97   : > { %391 = vrot.lane.b32.xlu1 %v347_v23, %s1448_s10 }
  0x98   : > { %v271_v24 = vpop.permute.xlu1 %270  ;;  %v261_v25 = vpop.permute.xlu0 %260 }
  0x99   : > { %v346_v27 = vmul.f32 %v261_v25, %v1555_v4  ;;  %v348_v32 = vmul.f32 %v271_v24, %v1552_v3 }
  0x9b   : > { %v1328_v28 = vpack.i.bf16 %v346_v27, %v345_v26 }
  0x9c   : > { %v281_v29 = vpop.permute.xlu1 %280  ;;  %v276_v30 = vpop.permute.xlu0 %275 }
  0x9d   : > { %v349_v31 = vmul.f32 %v276_v30, %v1563_v6  ;;  %1329 = vrot.lane.b32.xlu0 %v1328_v28, %s1448_s10  ;;  %v350_v36 = vmul.f32 %v281_v29, %v1560_v5 }
  0x9f   : > { %395 = vrot.lane.b32.xlu1 %v349_v31, %s1448_s10 }
  0xa0   : > { %v291_v33 = vpop.permute.xlu1 %290  ;;  %v286_v34 = vpop.permute.xlu0 %285 }
  0xa1   : > { %v351_v35 = vmul.f32 %v286_v34, %v1571_v8  ;;  %393 = vrot.lane.b32.xlu0 %v348_v32, %s1448_s10  ;;  %v352_v40 = vmul.f32 %v291_v33, %v1568_v7 }
  0xa3   : > { %399 = vrot.lane.b32.xlu1 %v351_v35, %s1448_s10 }
  0xa4   : > { %v301_v37 = vpop.permute.xlu1 %300  ;;  %v296_v38 = vpop.permute.xlu0 %295 }
  0xa5   : > { %v353_v39 = vmul.f32 %v296_v38, %v1579_v10  ;;  %397 = vrot.lane.b32.xlu0 %v350_v36, %s1448_s10  ;;  %v354_v44 = vmul.f32 %v301_v37, %v1576_v9 }
  0xa7   : > { %403 = vrot.lane.b32.xlu1 %v353_v39, %s1448_s10 }
  0xa8   : > { %v311_v41 = vpop.permute.xlu1 %310  ;;  %v306_v42 = vpop.permute.xlu0 %305 }
  0xa9   : > { %v355_v43 = vmul.f32 %v306_v42, %v1587_v12  ;;  %401 = vrot.lane.b32.xlu0 %v352_v40, %s1448_s10  ;;  %v356_v48 = vmul.f32 %v311_v41, %v1584_v11 }
  0xab   : > { %407 = vrot.lane.b32.xlu1 %v355_v43, %s1448_s10 }
  0xac   : > { %v321_v45 = vpop.permute.xlu1 %320  ;;  %v316_v46 = vpop.permute.xlu0 %315 }
  0xad   : > { %v357_v47 = vmul.f32 %v316_v46, %v1595_v14  ;;  %405 = vrot.lane.b32.xlu0 %v354_v44, %s1448_s10  ;;  %v358_v52 = vmul.f32 %v321_v45, %v1592_v13 }
  0xaf   : > { %411 = vrot.lane.b32.xlu1 %v357_v47, %s1448_s10 }
  0xb0   : > { %v331_v49 = vpop.permute.xlu1 %330  ;;  %v326_v50 = vpop.permute.xlu0 %325 }
  0xb1   : > { %v359_v51 = vmul.f32 %v326_v50, %v1603_v16  ;;  %409 = vrot.lane.b32.xlu0 %v356_v48, %s1448_s10  ;;  %v360_v56 = vmul.f32 %v331_v49, %v1600_v15 }
  0xb3   : > { %415 = vrot.lane.b32.xlu1 %v359_v51, %s1448_s10 }
  0xb4   : > { %v341_v53 = vpop.permute.xlu1 %340  ;;  %v336_v54 = vpop.permute.xlu0 %335 }
  0xb5   : > { %v361_v55 = vmul.f32 %v336_v54, %v1611_v18  ;;  %413 = vrot.lane.b32.xlu0 %v358_v52, %s1448_s10  ;;  %v362_v61 = vmul.f32 %v341_v53, %v1608_v17 }
  0xb7   : > { %419 = vrot.lane.b32.xlu1 %v361_v55, %s1448_s10 }
  0xb8   : > { %v251_v57 = vpop.permute.xlu1 %250  ;;  %v246_v58 = vpop.permute.xlu0 %245 }
  0xb9   : > { %v344_v59 = vmul.f32 %v251_v57, %v1616_v19  ;;  %v343_v60 = vmul.f32 %v246_v58, %v1619_v20  ;;  %417 = vrot.lane.b32.xlu0 %v360_v56, %s1448_s10 }
  0xbb   : > { %v1333_v62 = vpack.i.bf16 %v344_v59, %v343_v60 }
  0xbd   : > { %421 = vrot.lane.b32.xlu0 %v362_v61, %s1448_s10  ;;  %1334 = vrot.lane.b32.xlu1 %v1333_v62, %s1448_s10 }
 0x109   : > { %v392_v63 = vpop.permute.xlu1 %391 }
 0x10a   : > { %v1663_v23 = vsel %vm443_vm0, %v1544_v1, %v392_v63 }
 0x10b   : > { %v491_v30 = vrot.slane %v1663_v23, 1  ;;  %v552_v38 = vrot.slane %v1663_v23, 2 }
 0x10f   : > { %v1330_v0 = vpop.permute.xlu0 %1329 }
 0x110   : > { %v1332_v21 = vunpack.i.h.bf16 %v1330_v0  ;;  %v1331_v22 = vunpack.i.l.bf16 %v1330_v0 }
 0x111   : > { %v396_v24 = vpop.permute.xlu1 %395 }
 0x112   : > { %v447_v25 = vsel %vm443_vm0, %v1555_v4, %v1332_v21  ;;  %v1669_v26 = vsel %vm443_vm0, %v1547_v2, %v1331_v22  ;;  %v1681_v37 = vsel %vm443_vm0, %v1563_v6, %v396_v24 }
 0x113   : > { %v394_v27 = vpop.permute.xlu0 %393  ;;  %v488_v28 = vrot.slane %v1669_v26, 1  ;;  %v489_v29 = vrot.slane %v447_v25, 1  ;;  %v549_v4 = vrot.slane %v1669_v26, 2  ;;  %v550_v34 = vrot.slane %v447_v25, 2 }
 0x114   : > { %v449_v31 = vsel %vm443_vm0, %v1552_v3, %v394_v27  ;;  %v494_v42 = vrot.slane %v1681_v37, 1  ;;  %v555_v46 = vrot.slane %v1681_v37, 2 }
 0x115   : > { %v492_v1 = vrot.slane %v449_v31, 1  ;;  %v400_v32 = vpop.permute.xlu1 %399  ;;  %v490_v33 = vsel %vm484_vm1, %v488_v28, %v489_v29  ;;  %v553_v2 = vrot.slane %v449_v31, 2  ;;  %v551_v41 = vsel %vm545_vm2, %v549_v4, %v550_v34 }
 0x116   : > { %517 = vrot.lane.b32.xlu0 %v490_v33, %s1449_s11 }
 0x117   : > { %v398_v35 = vpop.permute.xlu0 %397  ;;  %v493_v36 = vsel %vm484_vm1, %v491_v30, %v492_v1  ;;  %v554_v6 = vsel %vm545_vm2, %v552_v38, %v553_v2 }
 0x118   : > { %v451_v3 = vsel %vm443_vm0, %v1560_v5, %v398_v35  ;;  %519 = vrot.lane.b32.xlu1 %v493_v36, %s1449_s11  ;;  %v1693_v5 = vsel %vm443_vm0, %v1571_v8, %v400_v32 }
 0x119   : > { %v495_v39 = vrot.slane %v451_v3, 1  ;;  %v404_v40 = vpop.permute.xlu1 %403  ;;  %v556_v43 = vrot.slane %v451_v3, 2  ;;  %v497_v50 = vrot.slane %v1693_v5, 1  ;;  %v558_v54 = vrot.slane %v1693_v5, 2 }
 0x11a   : > { %578 = vrot.lane.b32.xlu0 %v551_v41, %s1450_s12  ;;  %v1705_v53 = vsel %vm443_vm0, %v1579_v10, %v404_v40 }
 0x11b   : > { %v402_v44 = vpop.permute.xlu0 %401  ;;  %v496_v49 = vsel %vm484_vm1, %v494_v42, %v495_v39  ;;  %v557_v8 = vsel %vm545_vm2, %v555_v46, %v556_v43  ;;  %v500_v58 = vrot.slane %v1705_v53, 1  ;;  %v561_v62 = vrot.slane %v1705_v53, 2 }
 0x11c   : > { %v453_v45 = vsel %vm443_vm0, %v1568_v7, %v402_v44  ;;  %580 = vrot.lane.b32.xlu1 %v554_v6, %s1450_s12  ;;  %v1451_v44 = vmov 0.0   ;;  %v717_v6 = vld [vmem:[%s2061_s1 + $0x70] sm:$0xff] }
 0x11d   : > { %v498_v47 = vrot.slane %v453_v45, 1  ;;  %v408_v48 = vpop.permute.xlu1 %407  ;;  %v559_v51 = vrot.slane %v453_v45, 2  ;;  %751 = vmatprep.subr.mxu0 %v1451_v44  ;;  %1236 = vmatprep.subr.mxu1 %v1451_v44 }
 0x11e   : > { %521 = vrot.lane.b32.xlu0 %v496_v49, %s1449_s11  ;;  %v1717_v61 = vsel %vm443_vm0, %v1587_v12, %v408_v48  ;;  %v716_v48 = vld [vmem:[%s2061_s1 + $0x68] sm:$0xff] }
 0x11f   : > { %v406_v52 = vpop.permute.xlu0 %405  ;;  %v499_v57 = vsel %vm484_vm1, %v497_v50, %v498_v47  ;;  %v560_v10 = vsel %vm545_vm2, %v558_v54, %v559_v51  ;;  %v503_v22 = vrot.slane %v1717_v61, 1  ;;  %v564_v28 = vrot.slane %v1717_v61, 2  ;;  %v714_v54 = vld [vmem:[%s2061_s1 + $0x58] sm:$0xff] }
 0x120   : > { %v455_v7 = vsel %vm443_vm0, %v1576_v9, %v406_v52  ;;  %582 = vrot.lane.b32.xlu1 %v557_v8, %s1450_s12 }
 0x121   : > { %v501_v55 = vrot.slane %v455_v7, 1  ;;  %v412_v56 = vpop.permute.xlu1 %411  ;;  %v562_v59 = vrot.slane %v455_v7, 2 }
 0x122   : > { %523 = vrot.lane.b32.xlu0 %v499_v57, %s1449_s11  ;;  %v1729_v27 = vsel %vm443_vm0, %v1595_v14, %v412_v56 }
 0x123   : > { %v410_v60 = vpop.permute.xlu0 %409  ;;  %v502_v21 = vsel %vm484_vm1, %v500_v58, %v501_v55  ;;  %v563_v12 = vsel %vm545_vm2, %v561_v62, %v562_v59  ;;  %v506_v1 = vrot.slane %v1729_v27, 1  ;;  %v567_v35 = vrot.slane %v1729_v27, 2  ;;  %v713_v58 = vld [vmem:[%s2061_s1 + $0x50] sm:$0xff]  ;;  %v710_v62 = vld [vmem:[%s2061_s1 + $0x38] sm:$0xff] }
 0x124   : > { %v457_v9 = vsel %vm443_vm0, %v1584_v11, %v410_v60  ;;  %584 = vrot.lane.b32.xlu1 %v560_v10, %s1450_s12  ;;  %v712_v60 = vld [vmem:[%s2061_s1 + $0x48] sm:$0xff] }
 0x125   : > { %v504_v63 = vrot.slane %v457_v9, 1  ;;  %v416_v0 = vpop.permute.xlu1 %415  ;;  %v565_v24 = vrot.slane %v457_v9, 2  ;;  %v711_v9 = vld [vmem:[%s2061_s1 + $0x40] sm:$0xff] }
 0x126   : > { %525 = vrot.lane.b32.xlu0 %v502_v21, %s1449_s11  ;;  %v1738_v31 = vsel %vm443_vm0, %v1603_v16, %v416_v0  ;;  %v708_v0 = vld [vmem:[%s2061_s1 + $0x28] sm:$0xff]  ;;  %v707_v21 = vld [vmem:[%s2061_s1 + $0x20] sm:$0xff] }
 0x127   : > { %v414_v25 = vpop.permute.xlu0 %413  ;;  %v505_v30 = vsel %vm484_vm1, %v503_v22, %v504_v63  ;;  %v566_v33 = vsel %vm545_vm2, %v564_v28, %v565_v24  ;;  %v509_v4 = vrot.slane %v1738_v31, 1  ;;  %v570_v45 = vrot.slane %v1738_v31, 2  ;;  %v709_v63 = vld [vmem:[%s2061_s1 + $0x30] sm:$0xff]  ;;  %v706_v22 = vld [vmem:[%s2061_s1 + $0x18] sm:$0xff] }
 0x128   : > { %v459_v11 = vsel %vm443_vm0, %v1592_v13, %v414_v25  ;;  %586 = vrot.lane.b32.xlu1 %v563_v12, %s1450_s12  ;;  %v705_v24 = vld [vmem:[%s2061_s1 + $0x10] sm:$0xff]  ;;  %v704_v25 = vld [vmem:[%s2061_s1 + $0x8] sm:$0xff]  ;;  %v703_v12 = vld [vmem:[%s2061_s1] sm:$0xff] }
 0x129   : > { %v507_v29 = vrot.slane %v459_v11, 1  ;;  %v420_v14 = vpop.permute.xlu1 %419  ;;  %v568_v34 = vrot.slane %v459_v11, 2  ;;  %v722_v11 = vld [vmem:[%s2061_s1 + $0x98] sm:$0x1]  ;;  %v721_v28 = vld [vmem:[%s2061_s1 + $0x90] sm:$0xff] }
 0x12a   : > { %527 = vrot.lane.b32.xlu0 %v505_v30, %s1449_s11  ;;  %v1756_v40 = vsel %vm443_vm0, %v1611_v18, %v420_v14  ;;  %v719_v30 = vld [vmem:[%s2061_s1 + $0x80] sm:$0xff] }
 0x12b   : > { %v418_v32 = vpop.permute.xlu0 %417  ;;  %v508_v16 = vsel %vm484_vm1, %v506_v1, %v507_v29  ;;  %v569_v18 = vsel %vm545_vm2, %v567_v35, %v568_v34  ;;  %v512_v49 = vrot.slane %v1756_v40, 1  ;;  %v720_v29 = vld [vmem:[%s2061_s1 + $0x88] sm:$0xff] }
 0x12c   : > { %v461_v13 = vsel %vm443_vm0, %v1600_v15, %v418_v32  ;;  %588 = vrot.lane.b32.xlu1 %v566_v33, %s1450_s12  ;;  %v718_v15 = vld [vmem:[%s2061_s1 + $0x78] sm:$0xff] }
 0x12d   : > { %v510_v2 = vrot.slane %v461_v13, 1  ;;  %v571_v36 = vrot.slane %v461_v13, 2  ;;  %752 = vmatpush1.msra.mxu0 %v718_v15  ;;  %1256 = vmatpush1.msra.mxu1 %v718_v15 }
 0x12e   : > { %529 = vrot.lane.b32.xlu0 %v508_v16, %s1449_s11  ;;  %753 = vmatprep.subr.mxu0 %v1451_v44 }
 0x12f   : > { %v1335_v3 = vpop.permute.xlu1 %1334  ;;  %v422_v38 = vpop.permute.xlu0 %421  ;;  %v511_v39 = vsel %vm484_vm1, %v509_v4, %v510_v2  ;;  %v572_v51 = vsel %vm545_vm2, %v570_v45, %v571_v36  ;;  %754 = vmatpush1.msra.mxu0 %v717_v6  ;;  %1237 = vmatprep.subr.mxu1 %v1451_v44 }
 0x130   : > { %v1337_v41 = vunpack.i.h.bf16 %v1335_v3  ;;  %v1336_v42 = vunpack.i.l.bf16 %v1335_v3  ;;  %v463_v43 = vsel %vm443_vm0, %v1608_v17, %v422_v38  ;;  %531 = vrot.lane.b32.xlu1 %v511_v39, %s1449_s11  ;;  %755 = vmatprep.subr.mxu0 %v1451_v44 }
 0x131   : > { %v513_v46 = vrot.slane %v463_v43, 1  ;;  %v574_v50 = vrot.slane %v463_v43, 2  ;;  %756 = vmatpush1.msra.mxu0 %v716_v48  ;;  %1257 = vmatpush1.msra.mxu1 %v717_v6 }
 0x132   : > { %v445_v17 = vsel %vm443_vm0, %v1616_v19, %v1337_v41  ;;  %v1772_v47 = vsel %vm443_vm0, %v1619_v20, %v1336_v42  ;;  %590 = vrot.lane.b32.xlu0 %v569_v18, %s1450_s12  ;;  %v715_v19 = vld [vmem:[%s2061_s1 + $0x60] sm:$0xff]  ;;  %v573_v20 = vrot.slane %v1756_v40, 2  ;;  %757 = vmatprep.subr.mxu0 %v1451_v44 }
 0x133   : > { %v514_v52 = vsel %vm484_vm1, %v512_v49, %v513_v46  ;;  %v485_v8 = vrot.slane %v1772_v47, 1  ;;  %v486_v7 = vrot.slane %v445_v17, 1  ;;  %v546_v56 = vrot.slane %v1772_v47, 2  ;;  %758 = vmatpush1.msra.mxu0 %v715_v19  ;;  %1238 = vmatprep.subr.mxu1 %v1451_v44 }
 0x134   : > { %592 = vrot.lane.b32.xlu1 %v572_v51, %s1450_s12  ;;  %v575_v55 = vsel %vm545_vm2, %v573_v20, %v574_v50  ;;  %v547_v57 = vrot.slane %v445_v17, 2  ;;  %759 = vmatprep.subr.mxu0 %v1451_v44 }
 0x135   : > { %v487_v59 = vsel %vm484_vm1, %v485_v8, %v486_v7  ;;  %760 = vmatpush1.msra.mxu0 %v714_v54  ;;  %1258 = vmatpush1.msra.mxu1 %v716_v48 }
 0x136   : > { %533 = vrot.lane.b32.xlu0 %v514_v52, %s1449_s11  ;;  %761 = vmatprep.subr.mxu0 %v1451_v44  ;;  %v548_v10 = vsel %vm545_vm2, %v546_v56, %v547_v57 }
 0x137   : > { %762 = vmatpush1.msra.mxu0 %v713_v58  ;;  %1239 = vmatprep.subr.mxu1 %v1451_v44 }
 0x138   : > { %594 = vrot.lane.b32.xlu1 %v575_v55, %s1450_s12  ;;  %763 = vmatprep.subr.mxu0 %v1451_v44 }
 0x139   : > { %764 = vmatpush1.msra.mxu0 %v712_v60  ;;  %1259 = vmatpush1.msra.mxu1 %v715_v19 }
 0x13a   : > { %515 = vrot.lane.b32.xlu0 %v487_v59, %s1449_s11  ;;  %765 = vmatprep.subr.mxu0 %v1451_v44  ;;  %s1178_s11 = sshll.u32 %s215_s14, 6 }
 0x13b   : > { %766 = vmatpush1.msra.mxu0 %v711_v9  ;;  %1240 = vmatprep.subr.mxu1 %v1451_v44  ;;  %s217_s16 = scalar_lea.vmem [#allocation2], %s1178_s11 }
 0x13c   : > { %576 = vrot.lane.b32.xlu1 %v548_v10, %s1450_s12  ;;  %767 = vmatprep.subr.mxu0 %v1451_v44  ;;  %s1112_s23 = sshll.u32 %s217_s16, 4  ;;  %s2016_s23 = int_to_ptr.vmem [resolvable:$true] %s1112_s23 }
 0x13d   : > { %1260 = vmatpush1.msra.mxu1 %v714_v54  ;;  %768 = vmatpush1.msra.mxu0 %v710_v62  ;;  %p1392_p0 = scmp.lt.s32.totalorder %s2016_s23, %s1390_s8 }
 0x13e   : > { %1241 = vmatprep.subr.mxu1 %v1451_v44  ;;  %769 = vmatprep.subr.mxu0 %v1451_v44 }
 0x13f   : > { %1261 = vmatpush1.msra.mxu1 %v713_v58  ;;  %770 = vmatpush1.msra.mxu0 %v709_v63 }
 0x140   : > { %1242 = vmatprep.subr.mxu1 %v1451_v44  ;;  %771 = vmatprep.subr.mxu0 %v1451_v44 }
 0x141   : > { %1262 = vmatpush1.msra.mxu1 %v712_v60  ;;  %772 = vmatpush1.msra.mxu0 %v708_v0 }
 0x142   : > { %1243 = vmatprep.subr.mxu1 %v1451_v44  ;;  %773 = vmatprep.subr.mxu0 %v1451_v44 }
 0x143   : > { %1263 = vmatpush1.msra.mxu1 %v711_v9  ;;  %774 = vmatpush1.msra.mxu0 %v707_v21 }
 0x144   : > { %1244 = vmatprep.subr.mxu1 %v1451_v44  ;;  %775 = vmatprep.subr.mxu0 %v1451_v44 }
 0x145   : > { %1264 = vmatpush1.msra.mxu1 %v710_v62  ;;  %776 = vmatpush1.msra.mxu0 %v706_v22 }
 0x146   : > { %1245 = vmatprep.subr.mxu1 %v1451_v44  ;;  %777 = vmatprep.subr.mxu0 %v1451_v44 }
 0x147   : > { %1265 = vmatpush1.msra.mxu1 %v709_v63  ;;  %778 = vmatpush1.msra.mxu0 %v705_v24 }
 0x148   : > { %1246 = vmatprep.subr.mxu1 %v1451_v44  ;;  %779 = vmatprep.subr.mxu0 %v1451_v44 }
 0x149   : > { %1266 = vmatpush1.msra.mxu1 %v708_v0  ;;  %780 = vmatpush1.msra.mxu0 %v704_v25 }
 0x14a   : > { %1247 = vmatprep.subr.mxu1 %v1451_v44  ;;  %781 = vmatprep.subr.mxu0 %v1451_v44 }
 0x14b   : > { %1267 = vmatpush1.msra.mxu1 %v707_v21  ;;  %782 = vmatpush1.msra.mxu0 %v703_v12 }
 0x14c   : > { %1248 = vmatprep.subr.mxu1 %v1451_v44  ;;  %807 = vmatprep.subr.mxu0 %v1451_v44 }
 0x14d   : > { %1268 = vmatpush1.msra.mxu1 %v706_v22  ;;  %1181 = vmatpush2.msk.msra.mxu0 %vm747_vm3, %v722_v11 }
 0x14e   : > { %1249 = vmatprep.subr.mxu1 %v1451_v44  ;;  %809 = vmatprep.subr.mxu0 %v1451_v44 }
 0x14f   : > { %1269 = vmatpush1.msra.mxu1 %v705_v24  ;;  %810 = vmatpush2.msra.mxu0 %v721_v28 }
 0x150   : > { %1250 = vmatprep.subr.mxu1 %v1451_v44  ;;  %811 = vmatprep.subr.mxu0 %v1451_v44 }
 0x151   : > { %1270 = vmatpush1.msra.mxu1 %v704_v25  ;;  %812 = vmatpush2.msra.mxu0 %v720_v29 }
 0x152   : > { %1251 = vmatprep.subr.mxu1 %v1451_v44  ;;  %813 = vmatprep.subr.mxu0 %v1451_v44 }
 0x153   : > { %1271 = vmatpush1.msra.mxu1 %v703_v12  ;;  %814 = vmatpush2.msra.mxu0 %v719_v30 }
 0x154   : > { %1252 = vmatprep.subr.mxu1 %v1451_v44 }
 0x155   : > { %1272 = vmatpush2.msk.msra.mxu1 %vm747_vm3, %v722_v11 }
 0x156   : > { %1253 = vmatprep.subr.mxu1 %v1451_v44 }
 0x157   : > { %1273 = vmatpush2.msra.mxu1 %v721_v28 }
 0x158   : > { %1254 = vmatprep.subr.mxu1 %v1451_v44 }
 0x159   : > { %1274 = vmatpush2.msra.mxu1 %v720_v29 }
 0x15a   : > { %1255 = vmatprep.subr.mxu1 %v1451_v44 }
 0x15b   : > { %1275 = vmatpush2.msra.mxu1 %v719_v30 }
 0x188   : > { %v518_v1 = vpop.permute.xlu0 %517 }
 0x189   : > { %v608_v33 = vsel %vm606_vm4, %v1669_v26, %v518_v1 }
 0x18a   : > { %v520_v14 = vpop.permute.xlu1 %519 }
 0x18b   : > { %v609_v13 = vsel %vm606_vm4, %v1663_v23, %v520_v14 }
 0x18c   : > { %v579_v32 = vpop.permute.xlu0 %578 }
 0x18d   : > { %v1886_v34 = vsel %vm617_vm5, %v608_v33, %v579_v32 }
 0x18e   : > { %v581_v4 = vpop.permute.xlu1 %580 }
 0x18f   : > { %v1889_v2 = vsel %vm617_vm5, %v609_v13, %v581_v4 }
 0x190   : > { %661 = vrot.lane.b32.xlu1 %v1889_v2, %s1452_s30  ;;  %v522_v16 = vpop.permute.xlu0 %521  ;;  %v1338_v35 = vpack.i.bf16 %v1889_v2, %v1886_v34 }
 0x191   : > { %v610_v26 = vsel %vm606_vm4, %v1681_v37, %v522_v16 }
 0x192   : > { %v583_v36 = vpop.permute.xlu1 %582  ;;  %1339 = vrot.lane.b32.xlu0 %v1338_v35, %s1453_s6 }
 0x193   : > { %v1901_v38 = vsel %vm617_vm5, %v610_v26, %v583_v36 }
 0x194   : > { %v524_v23 = vpop.permute.xlu0 %523 }
 0x195   : > { %v611_v3 = vsel %vm606_vm4, %v1693_v5, %v524_v23 }
 0x196   : > { %v585_v39 = vpop.permute.xlu1 %584  ;;  %663 = vrot.lane.b32.xlu0 %v1901_v38, %s1452_s30 }
 0x197   : > { %v1906_v15 = vsel %vm617_vm5, %v611_v3, %v585_v39 }
 0x198   : > { %v526_v41 = vpop.permute.xlu0 %525  ;;  %v1343_v37 = vpack.i.bf16 %v1906_v15, %v1901_v38 }
 0x199   : > { %v612_v42 = vsel %vm606_vm4, %v1705_v53, %v526_v41 }
 0x19a   : > { %v587_v43 = vpop.permute.xlu1 %586  ;;  %665 = vrot.lane.b32.xlu0 %v1906_v15, %s1452_s30  ;;  %1344 = vrot.lane.b32.xlu1 %v1343_v37, %s1453_s6 }
 0x19b   : > { %v1918_v6 = vsel %vm617_vm5, %v612_v42, %v587_v43 }
 0x19c   : > { %v528_v5 = vpop.permute.xlu0 %527 }
 0x19d   : > { %v613_v44 = vsel %vm606_vm4, %v1717_v61, %v528_v5 }
 0x19e   : > { %v589_v45 = vpop.permute.xlu1 %588  ;;  %667 = vrot.lane.b32.xlu1 %v1918_v6, %s1452_s30 }
 0x19f   : > { %v1923_v46 = vsel %vm617_vm5, %v613_v44, %v589_v45 }
 0x1a0   : > { %v530_v53 = vpop.permute.xlu0 %529  ;;  %v1348_v18 = vpack.i.bf16 %v1923_v46, %v1918_v6 }
 0x1a1   : > { %v614_v61 = vsel %vm606_vm4, %v1729_v27, %v530_v53 }
 0x1a2   : > { %v532_v17 = vpop.permute.xlu1 %531  ;;  %669 = vrot.lane.b32.xlu1 %v1923_v46, %s1452_s30  ;;  %1349 = vrot.lane.b32.xlu0 %v1348_v18, %s1453_s6 }
 0x1a3   : > { %v615_v51 = vsel %vm606_vm4, %v1738_v31, %v532_v17 }
 0x1a4   : > { %v591_v48 = vpop.permute.xlu0 %590 }
 0x1a5   : > { %v1933_v49 = vsel %vm617_vm5, %v614_v61, %v591_v48 }
 0x1a6   : > { %v593_v50 = vpop.permute.xlu1 %592  ;;  %671 = vrot.lane.b32.xlu1 %v1933_v49, %s1452_s30  ;;  %648 = vrot.lane.b32.xlu0 %v1933_v49, %s1453_s6 }
 0x1a7   : > { %v626_v20 = vsel %vm617_vm5, %v615_v51, %v593_v50 }
 0x1a8   : > { %v534_v19 = vpop.permute.xlu0 %533 }
 0x1a9   : > { %v616_v27 = vsel %vm606_vm4, %v1756_v40, %v534_v19 }
 0x1aa   : > { %v595_v52 = vpop.permute.xlu1 %594  ;;  %650 = vrot.lane.b32.xlu1 %v626_v20, %s1453_s6  ;;  %673 = vrot.lane.b32.xlu0 %v626_v20, %s1452_s30  ;;  %s1385_s6 = scalar_lea.vmem %s2016_s23, 1024 }
 0x1ab   : > { %v627_v54 = vsel %vm617_vm5, %v616_v27, %v595_v52  ;;  %p1386_p11 = scmp.ne.s32.totalorder %s2016_s23, %s1385_s6  ;;  %p1393_p1 = scmp.lt.s32.totalorder %s1391_s9, %s1385_s6 }
 0x1ac   : > { %v516_v8 = vpop.permute.xlu0 %515 }
 0x1ad   : > { %v607_v7 = vsel %vm606_vm4, %v1772_v47, %v516_v8  ;;  %p1387_p12 = pnand %p1386_p11, %p1526_p5  ;;  %p1394_p2 = por %p1393_p1, %p1392_p0 }
 0x1ae   : > { %v577_v55 = vpop.permute.xlu1 %576  ;;  %675 = vrot.lane.b32.xlu0 %v627_v54, %s1452_s30  ;;  %s2014_s30 = scalar_lea.hbm %s2065_s5, %s1212_s17 }
 0x1af   : > { %v618_v31 = vsel %vm617_vm5, %v607_v7, %v577_v55  ;;  %p1388_p13 = pneg %p1387_p12 }
 0x1b1   : > { %p1395_p3 = pnand %p1394_p2, %p1388_p13 }
 0x202   : > { %v662_v56 = vpop.permute.xlu1 %661 }
 0x203   : > { %1182 = vmatprep.mubr.msk.f32.mxu0 %vm730_vm6, %v662_v56 }
 0x204   : > { %v1340_v40 = vpop.permute.xlu0 %1339 }
 0x205   : > { %v1342_v57 = vunpack.i.h.bf16 %v1340_v40  ;;  %v1341_v58 = vunpack.i.l.bf16 %v1340_v40 }
 0x207   : > { %v686_v59 = vsel %vm685_vm7, %v618_v31, %v1341_v58  ;;  %v687_v10 = vsel %vm685_vm7, %v1886_v34, %v1342_v57 }
 0x208   : > { %v664_v60 = vpop.permute.xlu0 %663  ;;  %v695_v47 = vsel %vm694_vm8, %v686_v59, %v662_v56 }
 0x209   : > { %816 = vmatmul.mubr.f32.vlgmr.msra.gmra.mxu0 %v695_v47  ;;  %v696_v63 = vsel %vm694_vm8, %v687_v10, %v664_v60 }
 0x20a   : > { %1183 = vmatprep.mubr.msk.f32.mxu0 %vm730_vm6, %v664_v60 }
 0x20c   : > { %v1345_v9 = vpop.permute.xlu1 %1344  ;;  %v666_v62 = vpop.permute.xlu0 %665 }
 0x20d   : > { %v1347_v0 = vunpack.i.h.bf16 %v1345_v9  ;;  %v1346_v21 = vunpack.i.l.bf16 %v1345_v9  ;;  %821 = vmatmul.mubr.f32.gmra.mxu0 %v696_v63  ;;  %v952_v63 = vld [vmem:[%s2063_s3] sm:$0xff] }
 0x20e   : > { %1184 = vmatprep.mubr.msk.f32.mxu0 %vm730_vm6, %v666_v62  ;;  %1222 = vmatprep.subr.mxu1 %v952_v63 }
 0x20f   : > { %v688_v22 = vsel %vm685_vm7, %v1889_v2, %v1346_v21  ;;  %v689_v12 = vsel %vm685_vm7, %v1901_v38, %v1347_v0  ;;  %v1180_v38 = vld [vmem:[%s2062_s2] ss:$0 sm:$0xff] }
 0x210   : > { %v668_v24 = vpop.permute.xlu1 %667  ;;  %v697_v25 = vsel %vm694_vm8, %v688_v22, %v666_v62 }
 0x211   : > { %826 = vmatmul.mubr.f32.gmra.mxu0 %v697_v25  ;;  %v698_v29 = vsel %vm694_vm8, %v689_v12, %v668_v24 }
 0x212   : > { %1185 = vmatprep.mubr.msk.f32.mxu0 %vm730_vm6, %v668_v24 }
 0x214   : > { %v670_v11 = vpop.permute.xlu1 %669  ;;  %v1350_v28 = vpop.permute.xlu0 %1349 }
 0x215   : > { %v1352_v30 = vunpack.i.h.bf16 %v1350_v28  ;;  %v1351_v1 = vunpack.i.l.bf16 %v1350_v28  ;;  %831 = vmatmul.mubr.f32.gmra.mxu0 %v698_v29 }
 0x216   : > { %1186 = vmatprep.mubr.msk.f32.mxu0 %vm730_vm6, %v670_v11 }
 0x217   : > { %v690_v14 = vsel %vm685_vm7, %v1906_v15, %v1351_v1  ;;  %v691_v4 = vsel %vm685_vm7, %v1918_v6, %v1352_v30 }
 0x218   : > { %v672_v32 = vpop.permute.xlu1 %671  ;;  %v649_v33 = vpop.permute.xlu0 %648  ;;  %v699_v13 = vsel %vm694_vm8, %v690_v14, %v670_v11 }
 0x219   : > { %836 = vmatmul.mubr.f32.gmra.mxu0 %v699_v13  ;;  %v692_v34 = vsel %vm685_vm7, %v1923_v46, %v649_v33  ;;  %v700_v16 = vsel %vm694_vm8, %v691_v4, %v672_v32 }
 0x21a   : > { %1187 = vmatprep.mubr.msk.f32.mxu0 %vm730_vm6, %v672_v32 }
 0x21c   : > { %v674_v2 = vpop.permute.xlu0 %673  ;;  %v651_v35 = vpop.permute.xlu1 %650 }
 0x21d   : > { %841 = vmatmul.mubr.f32.gmra.mxu0 %v700_v16  ;;  %1188 = vmatprep.mubr.msk.f32.mxu1 %vm730_vm6, %v674_v2  ;;  %v701_v26 = vsel %vm694_vm8, %v692_v34, %v674_v2  ;;  %v693_v36 = vsel %vm685_vm7, %v1933_v49, %v651_v35 }
 0x21e   : > { %846 = vmatmul.mubr.f32.vlgmr.msra.gmra.mxu1 %v701_v26 }
 0x21f   : > { %1223 = vmatpush3.msra.mxu1 %v952_v63 }
 0x220   : > { %v676_v23 = vpop.permute.xlu0 %675 }
 0x221   : > { %1189 = vmatprep.mubr.msk.f32.mxu1 %vm730_vm6, %v676_v23  ;;  %v702_v3 = vsel %vm694_vm8, %v693_v36, %v676_v23 }
 0x222   : > { %851 = vmatmul.mubr.f32.gmra.mxu1 %v702_v3 }
 0x2c9   : > { %v817_v39 = vpop.f32.mrf.mxu0 }
 0x2ca   : > { %v818_v15 = vadd.f32 %v1180_v38, %v817_v39 }
 0x2cb   : > { %v819_v41 = vpop.f32.mrf.mxu0 }
 0x2cc   : > { %v1190_v37 = vmul.f32 -1.442695, %v818_v15 }
 0x2cd   : > { %v822_v42 = vpop.f32.mrf.mxu0 }
 0x2ce   : > { %1353 = vpow2.f32 %v1190_v37  ;;  %v823_v43 = vadd.f32 %v1180_v38, %v822_v42 }
 0x2cf   : > { %v824_v5 = vpop.f32.mrf.mxu0 }
 0x2d0   : > { %v1191_v44 = vmul.f32 -1.442695, %v823_v43 }
 0x2d1   : > { %v827_v6 = vpop.f32.mrf.mxu0 }
 0x2d2   : > { %1355 = vpow2.f32 %v1191_v44  ;;  %v828_v45 = vadd.f32 %v1180_v38, %v827_v6 }
 0x2d3   : > { %v829_v46 = vpop.f32.mrf.mxu0 }
 0x2d4   : > { %v1192_v53 = vmul.f32 -1.442695, %v828_v45 }
 0x2d5   : > { %v832_v18 = vpop.f32.mrf.mxu0 }
 0x2d6   : > { %1357 = vpow2.f32 %v1192_v53  ;;  %v833_v17 = vadd.f32 %v1180_v38, %v832_v18 }
 0x2d7   : > { %v834_v61 = vpop.f32.mrf.mxu0 }
 0x2d8   : > { %v1193_v48 = vmul.f32 -1.442695, %v833_v17 }
 0x2d9   : > { %v837_v49 = vpop.f32.mrf.mxu0 }
 0x2da   : > { %1359 = vpow2.f32 %v1193_v48  ;;  %v838_v50 = vadd.f32 %v1180_v38, %v837_v49 }
 0x2db   : > { %v1354_v51 = vpop.eup %1353  ;;  %v839_v19 = vpop.f32.mrf.mxu0 }
 0x2dc   : > { %v880_v20 = vadd.f32 1.0, %v1354_v51  ;;  %v1194_v27 = vmul.f32 -1.442695, %v838_v50 }
 0x2dd   : > { %v842_v52 = vpop.f32.mrf.mxu0 }
 0x2de   : > { %1361 = vrcp.f32 %v880_v20  ;;  %v843_v8 = vadd.f32 %v1180_v38, %v842_v52  ;;  %v847_v7 = vpop.f32.mrf.mxu1 }
 0x2df   : > { %v1356_v54 = vpop.eup %1355  ;;  %1363 = vpow2.f32 %v1194_v27  ;;  %v848_v55 = vadd.f32 %v1180_v38, %v847_v7  ;;  %v844_v31 = vpop.f32.mrf.mxu0 }
 0x2e0   : > { %v881_v56 = vadd.f32 1.0, %v1356_v54  ;;  %v1195_v40 = vmul.f32 -1.442695, %v843_v8  ;;  %v849_v57 = vpop.f32.mrf.mxu1 }
 0x2e1   : > { %v1196_v58 = vmul.f32 -1.442695, %v848_v55 }
 0x2e2   : > { %1365 = vrcp.f32 %v881_v56  ;;  %v852_v59 = vpop.f32.mrf.mxu1 }
 0x2e3   : > { %v1358_v60 = vpop.eup %1357  ;;  %1367 = vpow2.f32 %v1195_v40  ;;  %v853_v47 = vadd.f32 %v1180_v38, %v852_v59 }
 0x2e4   : > { %v882_v10 = vadd.f32 1.0, %v1358_v60  ;;  %1369 = vpow2.f32 %v1196_v58  ;;  %v854_v9 = vpop.f32.mrf.mxu1 }
 0x2e5   : > { %v1197_v62 = vmul.f32 -1.442695, %v853_v47 }
 0x2e6   : > { %1371 = vrcp.f32 %v882_v10 }
 0x2e7   : > { %v1360_v0 = vpop.eup %1359  ;;  %1373 = vpow2.f32 %v1197_v62 }
 0x2e8   : > { %v883_v21 = vadd.f32 1.0, %v1360_v0 }
 0x2ea   : > { %1375 = vrcp.f32 %v883_v21 }
 0x2eb   : > { %v1362_v22 = vpop.eup %1361 }
 0x2ec   : > { %v1364_v24 = vpop.eup %1363  ;;  %v904_v25 = vmul.f32 %v1362_v22, %v818_v15 }
 0x2ed   : > { %v884_v12 = vadd.f32 1.0, %v1364_v24 }
 0x2ee   : > { %920 = vrot.lane.b32.xlu1 %v904_v25, %s1454_s13 }
 0x2ef   : > { %v1366_v11 = vpop.eup %1365  ;;  %1377 = vrcp.f32 %v884_v12 }
 0x2f0   : > { %v1368_v28 = vpop.eup %1367  ;;  %v905_v29 = vmul.f32 %v1366_v11, %v823_v43 }
 0x2f1   : > { %v1370_v30 = vpop.eup %1369  ;;  %v885_v1 = vadd.f32 1.0, %v1368_v28 }
 0x2f2   : > { %v886_v14 = vadd.f32 1.0, %v1370_v30  ;;  %922 = vrot.lane.b32.xlu0 %v905_v29, %s1454_s13 }
 0x2f3   : > { %v1372_v32 = vpop.eup %1371  ;;  %1379 = vrcp.f32 %v885_v1 }
 0x2f4   : > { %v1374_v33 = vpop.eup %1373  ;;  %v906_v13 = vmul.f32 %v1372_v32, %v828_v45  ;;  %1381 = vrcp.f32 %v886_v14 }
 0x2f5   : > { %v887_v4 = vadd.f32 1.0, %v1374_v33 }
 0x2f6   : > { %924 = vrot.lane.b32.xlu1 %v906_v13, %s1454_s13 }
 0x2f7   : > { %v1376_v34 = vpop.eup %1375  ;;  %1383 = vrcp.f32 %v887_v4 }
 0x2f8   : > { %v907_v2 = vmul.f32 %v1376_v34, %v833_v17 }
 0x2fa   : > { %926 = vrot.lane.b32.xlu0 %v907_v2, %s1454_s13 }
 0x2fc   : > { %v1378_v16 = vpop.eup %1377 }
 0x2fd   : > { %v908_v35 = vmul.f32 %v1378_v16, %v838_v50  ;;  %v1198_v50 = vld [vmem:[%s2064_s4] ss:$0 sm:$0xff] }
 0x2ff   : > { %928 = vrot.lane.b32.xlu1 %v908_v35, %s1454_s13 }
 0x300   : > { %v1380_v26 = vpop.eup %1379 }
 0x301   : > { %v1382_v36 = vpop.eup %1381  ;;  %v909_v23 = vmul.f32 %v1380_v26, %v843_v8 }
 0x302   : > { %v910_v3 = vmul.f32 %v1382_v36, %v848_v55 }
 0x303   : > { %930 = vrot.lane.b32.xlu0 %v909_v23, %s1454_s13 }
 0x304   : > { %v1384_v38 = vpop.eup %1383  ;;  %932 = vrot.lane.b32.xlu1 %v910_v3, %s1454_s13 }
 0x305   : > { %v911_v39 = vmul.f32 %v1384_v38, %v853_v47 }
 0x307   : > { %934 = vrot.lane.b32.xlu0 %v911_v39, %s1454_s13 }
 0x360   : > { %v921_v15 = vpop.permute.xlu1 %920 }
 0x361   : > { %v944_v41 = vmul.f32 %v921_v15, %v904_v25 }
 0x363   : > { %1224 = vmatprep.mubr.msk.f32.mxu1 %vm960_vm9, %v944_v41 }
 0x364   : > { %v923_v37 = vpop.permute.xlu0 %922 }
 0x365   : > { %v945_v42 = vmul.f32 %v923_v37, %v905_v29 }
 0x367   : > { %1225 = vmatmul.mubr.msk.f32.vlgmr.msra.gmra.mxu1 %vm960_vm9, %v945_v42 }
 0x368   : > { %v925_v43 = vpop.permute.xlu1 %924 }
 0x369   : > { %v946_v5 = vmul.f32 %v925_v43, %v906_v13 }
 0x36b   : > { %1227 = vmatprep.mubr.msk.f32.mxu1 %vm960_vm9, %v946_v5 }
 0x36c   : > { %v927_v44 = vpop.permute.xlu0 %926 }
 0x36d   : > { %v947_v6 = vmul.f32 %v927_v44, %v907_v2 }
 0x36f   : > { %1228 = vmatmul.mubr.msk.f32.gmra.mxu1 %vm960_vm9, %v947_v6 }
 0x371   : > { %v929_v45 = vpop.permute.xlu1 %928 }
 0x372   : > { %v948_v46 = vmul.f32 %v929_v45, %v908_v35 }
 0x374   : > { %1230 = vmatprep.mubr.msk.f32.mxu1 %vm960_vm9, %v948_v46 }
 0x375   : > { %v931_v53 = vpop.permute.xlu0 %930 }
 0x376   : > { %v949_v18 = vmul.f32 %v931_v53, %v909_v23  ;;  %v933_v17 = vpop.permute.xlu1 %932 }
 0x377   : > { %v950_v61 = vmul.f32 %v933_v17, %v910_v3 }
 0x378   : > { %1231 = vmatmul.mubr.msk.f32.gmra.mxu1 %vm960_vm9, %v949_v18 }
 0x379   : > { %1233 = vmatprep.mubr.msk.f32.mxu1 %vm960_vm9, %v950_v61  ;;  %v935_v48 = vpop.permute.xlu0 %934 }
 0x37a   : > { %v951_v49 = vmul.f32 %v935_v48, %v911_v39 }
 0x37c   : > { %1234 = vmatmul.mubr.msk.f32.gmra.mxu1 %vm960_vm9, %v951_v49 }
 0x427   : > { %v1226_v51 = vpop.f32.mrf.mxu1 }
 0x428   : > { %v1057_v19 = vadd.f32 %v1226_v51, %v1198_v50 }
 0x429   : > { %v1051_v20 = vpop.f32.mrf.mxu1 }
 0x42a   : > { %1091 = vst [vmem:[%s217_s16 + $0x8] sm:$0xff] %v1057_v19  ;;  %v1052_v27 = vadd.f32 %v1198_v50, %v1051_v20 }
 0x42c   : > { %1090 = vst [vmem:[%s217_s16] sm:$0xff] %v1052_v27 }
 0x42f   : > { %v1229_v52 = vpop.f32.mrf.mxu1 }
 0x430   : > { %v1067_v8 = vadd.f32 %v1229_v52, %v1198_v50 }
 0x431   : > { %v1061_v7 = vpop.f32.mrf.mxu1 }
 0x432   : > { %1093 = vst [vmem:[%s217_s16 + $0x18] sm:$0xff] %v1067_v8  ;;  %v1062_v54 = vadd.f32 %v1198_v50, %v1061_v7 }
 0x434   : > { %1092 = vst [vmem:[%s217_s16 + $0x10] sm:$0xff] %v1062_v54 }
 0x438   : > { %v1232_v55 = vpop.f32.mrf.mxu1 }
 0x439   : > { %v1077_v31 = vadd.f32 %v1232_v55, %v1198_v50 }
 0x43a   : > { %v1071_v56 = vpop.f32.mrf.mxu1 }
 0x43b   : > { %1095 = vst [vmem:[%s217_s16 + $0x28] sm:$0xff] %v1077_v31  ;;  %v1072_v40 = vadd.f32 %v1198_v50, %v1071_v56 }
 0x43c   : > { %v1235_v57 = vpop.f32.mrf.mxu1 }
 0x43d   : > { %1094 = vst [vmem:[%s217_s16 + $0x20] sm:$0xff] %v1072_v40  ;;  %v1087_v58 = vadd.f32 %v1235_v57, %v1198_v50 }
 0x43e   : > { %v1081_v59 = vpop.f32.mrf.mxu1 }
 0x43f   : > { %1097 = vst [vmem:[%s217_s16 + $0x38] sm:$0xff] %v1087_v58  ;;  %v1082_v60 = vadd.f32 %v1198_v50, %v1081_v59 }
 0x441   : > { %1096 = vst [vmem:[%s217_s16 + $0x30] sm:$0xff] %v1082_v60 }
 0x442   : > { %1398 = shalt.err (!%p1395_p3)
}
 0x443   : > { %s1399_s10 = scalar_lea.hbm %s2014_s30, 1024  ;;  %s1403_s11 = scalar_lea.hbm %s2065_s5, 2048 }
 0x444   : > { %p1400_p4 = scmp.ne.s32.totalorder %s2014_s30, %s1399_s10  ;;  %p1404_p9 = scmp.lt.s32.totalorder %s2014_s30, %s2065_s5 }
 0x445   : > { %p1405_p10 = scmp.lt.s32.totalorder %s1403_s11, %s1399_s10 }
 0x446   : > { %p1401_p7 = pnand %p1400_p4, %p1526_p5 }
 0x447   : > { %p1406_p11 = por %p1405_p10, %p1404_p9 }
 0x448   : > { %p1402_p8 = pneg %p1401_p7 }
 0x44a   : > { %p1407_p12 = pnand %p1406_p11, %p1402_p8 }
 0x44c   : > { %1410 = shalt.err (!%p1407_p12)
}
 0x44d   : > { %s1456_s16 = smov 128   ;;  %s1457_s17 = smov 8  }
 0x44e   : > { %1277 = dma.vmem_to_hbm [thread:$0]  (%p1526_p5), %s2016_s23, 1024, %s2014_s30, %s2020_s22, %s1456_s16, %s1456_s16, %s1457_s17  }
 0x44f PF: > { %p1283_p13 = scmp.ge.s32.totalorder %s1445_s21, 2  ;;  %s1127_s25 = sand.u32 1, %s1433_s18  }
 0x450   : > { %s1128_s26 = scalar_lea.sflag [#allocation3], %s1127_s25 }
 0x451   : > { %p1280_p0 = pnand %p1283_p13, %p1530_p6 }
 0x453   : > { %p1281_p1 = pneg %p1280_p0 }
 0x455   : > { %1428 = dma.done.wait (%p1281_p1), %s1128_s26, 1024  }
 0x456   : > { %1430 = vsyncadd (%p1281_p1), %s1128_s26, 4294966272  ;;  %p15_p2 = scmp.ge.s32.totalorder %s1513_s24, 4   ;;  %s2068_s18 = smov %s1437_s19 }
 0x457   : > { %s2069_s19 = smov %s1441_s20  ;;  %s2070_s20 = smov %s1524_s27 }
 0x458   : > { %s2071_s21 = smov %s1513_s24  ;;  %17 = sbr.rel (!%p15_p2) target bundleno = 3 (0x3), region = 75 }
 0x45d   :  { %1133 = vsyncpa [#allocation3], 1 }
 0x45e   :  { %1135 = vsyncpa [#allocation3 + $0x1], 1 }

</bundles_post_ra>
